<compile_context>
chip_gen: v6e
topology: v6e:2x2x1
jax: 0.10.0
libtpu: 0.0.40
codegen_flags: <defaults>
</compile_context>

<pallas_src>
import functools

import jax
import jax.numpy as jnp
from jax.experimental import pallas as pl
from jax.experimental.pallas import tpu as pltpu


def _round_up(x, m):
    return ((x + m - 1) // m) * m


def mlp_kan_kernel(x_ref, wt_ref, bt_ref, o_ref, *, compute_dtype):
    # x_ref : (bm, in_dim)   batch tile of X
    # wt_ref: (in_dim, bo)   W^T tile (out tile on lanes)
    # bt_ref: (in_dim, bo)   B^T tile
    # o_ref : (bm, bo)       output tile (lane-dense)
    x = x_ref[...].astype(compute_dtype)          # (bm, in_dim)
    wt = wt_ref[...].astype(compute_dtype)        # (in_dim, bo)
    bt = bt_ref[...].astype(compute_dtype)        # (in_dim, bo)

    # z[b, i, o] = X[b, i] * W[o, i] + B[o, i]
    z = x[:, :, None] * wt[None, :, :] + bt[None, :, :]    # (bm, in_dim, bo)

    # SiLU with a single transcendental per element (one EUP push):
    #   sigmoid(z) = 0.5 * (tanh(0.5 * z) + 1)
    act = z * (0.5 * (jnp.tanh(0.5 * z) + 1.0))

    # Reduce over in_dim (sublane axis); accumulate in f32.
    acc = jnp.sum(act, axis=1, dtype=jnp.float32)           # (bm, bo)
    o_ref[...] = acc.astype(o_ref.dtype)


def mlp_kan_layer(x, weight, bias, *, block_batch=None, block_out=None,
                  compute_dtype=jnp.float32):
    """Pallas implementation of MLP_KAN_Layer.forward.

    x:      (batch, in_dim)
    weight: (out_dim, in_dim)
    bias:   (out_dim, in_dim)
    returns (batch, out_dim) float32

    compute_dtype: keep f32 on v5e; jnp.bfloat16 is a valid speedup on
    v6e/v7x (the reduction always accumulates in f32).
    """
    batch, in_dim = x.shape
    out_dim, in_dim_w = weight.shape
    assert in_dim == in_dim_w
    assert bias.shape == (out_dim, in_dim)

    # ---- Tile selection --------------------------------------------------
    out_pad = _round_up(out_dim, 128)          # lane-dense output
    batch_pad = _round_up(batch, 8)            # sublane-aligned batch

    if block_out is None:
        block_out = 256 if (out_pad % 256 == 0 and out_pad >= 256) else 128
        block_out = min(block_out, out_pad)
    if block_batch is None:
        # Keep ~3 * bm * in_dim * block_out * 4B of live intermediates under
        # ~12 MiB (fits comfortably in scoped VMEM on all generations).
        budget_elems = (12 * 1024 * 1024) // (3 * 4)
        bm = budget_elems // max(1, in_dim * block_out)
        bm = max(8, min(batch_pad, (bm // 8) * 8, 512))
        block_batch = bm

    batch_pad = _round_up(batch_pad, block_batch)
    out_pad = _round_up(out_pad, block_out)

    # ---- Pad & transpose operands (layout plumbing, outside the kernel) ---
    x_p = x
    if batch_pad != batch:
        x_p = jnp.pad(x, ((0, batch_pad - batch), (0, 0)))
    wt = weight.T                              # (in_dim, out_dim)
    bt = bias.T
    if out_pad != out_dim:
        wt = jnp.pad(wt, ((0, 0), (0, out_pad - out_dim)))
        bt = jnp.pad(bt, ((0, 0), (0, out_pad - out_dim)))

    grid = (out_pad // block_out, batch_pad // block_batch)

    kernel = functools.partial(mlp_kan_kernel, compute_dtype=compute_dtype)

    elems = batch_pad * out_pad * in_dim
    cost = pl.CostEstimate(
        flops=6 * elems,
        transcendentals=elems,
        bytes_accessed=4 * (batch_pad * in_dim + 2 * in_dim * out_pad
                            + batch_pad * out_pad),
    )

    out = pl.pallas_call(
        kernel,
        out_shape=jax.ShapeDtypeStruct((batch_pad, out_pad), jnp.float32),
        grid_spec=pltpu.PrefetchScalarGridSpec(
            num_scalar_prefetch=0,
            grid=grid,
            in_specs=[
                # batch tile of X (in_dim = full extent)
                pl.BlockSpec((block_batch, in_dim), lambda o, b: (b, 0)),
                # W^T / B^T out-tiles (lane-dense, 128-aligned)
                pl.BlockSpec((in_dim, block_out), lambda o, b: (0, o)),
                pl.BlockSpec((in_dim, block_out), lambda o, b: (0, o)),
            ],
            out_specs=pl.BlockSpec((block_batch, block_out),
                                   lambda o, b: (b, o)),
        ),
        compiler_params=pltpu.CompilerParams(
            dimension_semantics=("parallel", "parallel"),
            vmem_limit_bytes=32 * 1024 * 1024,
        ),
        cost_estimate=cost,
    )(x_p, wt, bt)

    return out[:batch, :out_dim]


def mlp_kan_reference(x, weight, bias):
    z = weight[None, :, :] * x[:, None, :] + bias[None, :, :]
    return jnp.sum(z * jax.nn.sigmoid(z), axis=-1)


if __name__ == "__main__":
    key = jax.random.PRNGKey(0)
    k_x, k_w, k_b = jax.random.split(key, 3)

    batch, in_dim, out_dim = 8, 32, 16

    # Deterministic "randn"-style parameter init (matches torch.randn shapes).
    x = jax.random.normal(k_x, (batch, in_dim), dtype=jnp.float32)
    weight = jax.random.normal(k_w, (out_dim, in_dim), dtype=jnp.float32)
    bias = jax.random.normal(k_b, (out_dim, in_dim), dtype=jnp.float32)

    y = mlp_kan_layer(x, weight, bias)
    y = jax.block_until_ready(y)

    y_ref = mlp_kan_reference(x, weight, bias)
    assert y.shape == (batch, out_dim)
    assert jnp.allclose(y, y_ref, atol=1e-3, rtol=1e-3), "mismatch vs reference"

    print("KERNEL_OK")
</pallas_src>

<mosaic_0001>
module attributes {stable_mosaic.version = 11 : i64} {
  func.func @mlp_kan_kernel(%arg0: i32, %arg1: i32, %arg2: memref<8x32xf32, #tpu.memory_space<vmem>>, %arg3: memref<32x128xf32, #tpu.memory_space<vmem>>, %arg4: memref<32x128xf32, #tpu.memory_space<vmem>>, %arg5: memref<8x128xf32, #tpu.memory_space<vmem>>) attributes {dimension_semantics = [#tpu.dimension_semantics<parallel>, #tpu.dimension_semantics<parallel>], iteration_bounds = array<i64: 1, 1>, scalar_prefetch = 0 : i64, scratch_operands = 0 : i64, tpu.core_type = #tpu.core_type<tc>, window_params = [{transform_indices = @transform_0, window_bounds = array<i64: 8, 32>}, {transform_indices = @transform_1, window_bounds = array<i64: 32, 128>}, {transform_indices = @transform_2, window_bounds = array<i64: 32, 128>}, {transform_indices = @transform_3, window_bounds = array<i64: 8, 128>}]} {
    %c0 = arith.constant 0 : index
    %c0_0 = arith.constant 0 : index
    %0 = vector.load %arg2[%c0, %c0_0] : memref<8x32xf32, #tpu.memory_space<vmem>>, vector<8x32xf32>
    %c0_1 = arith.constant 0 : index
    %c0_2 = arith.constant 0 : index
    %1 = vector.load %arg3[%c0_1, %c0_2] : memref<32x128xf32, #tpu.memory_space<vmem>>, vector<32x128xf32>
    %c0_3 = arith.constant 0 : index
    %c0_4 = arith.constant 0 : index
    %2 = vector.load %arg4[%c0_3, %c0_4] : memref<32x128xf32, #tpu.memory_space<vmem>>, vector<32x128xf32>
    %3 = vector.shape_cast %0 : vector<8x32xf32> to vector<8x32x1xf32>
    %4 = vector.shape_cast %1 : vector<32x128xf32> to vector<1x32x128xf32>
    %5 = vector.broadcast %3 : vector<8x32x1xf32> to vector<8x32x128xf32>
    %6 = vector.broadcast %4 : vector<1x32x128xf32> to vector<8x32x128xf32>
    %7 = arith.mulf %5, %6 : vector<8x32x128xf32>
    %8 = vector.shape_cast %2 : vector<32x128xf32> to vector<1x32x128xf32>
    %9 = vector.broadcast %8 : vector<1x32x128xf32> to vector<8x32x128xf32>
    %10 = arith.addf %7, %9 : vector<8x32x128xf32>
    %cst = arith.constant 5.000000e-01 : f32
    %11 = vector.broadcast %cst : f32 to vector<8x32x128xf32>
    %12 = arith.mulf %11, %10 : vector<8x32x128xf32>
    %13 = math.tanh %12 : vector<8x32x128xf32>
    %cst_5 = arith.constant 1.000000e+00 : f32
    %14 = vector.broadcast %cst_5 : f32 to vector<8x32x128xf32>
    %15 = arith.addf %13, %14 : vector<8x32x128xf32>
    %cst_6 = arith.constant 5.000000e-01 : f32
    %16 = vector.broadcast %cst_6 : f32 to vector<8x32x128xf32>
    %17 = arith.mulf %16, %15 : vector<8x32x128xf32>
    %18 = arith.mulf %10, %17 : vector<8x32x128xf32>
    %cst_7 = arith.constant dense<0.000000e+00> : vector<8x128xf32>
    %19 = vector.multi_reduction <add>, %18, %cst_7 [1] : vector<8x32x128xf32> to vector<8x128xf32>
    %c0_8 = arith.constant 0 : index
    %c0_9 = arith.constant 0 : index
    %20 = vector.load %arg5[%c0_8, %c0_9] : memref<8x128xf32, #tpu.memory_space<vmem>>, vector<8x128xf32>
    tpu.vector_store %arg5[%c0_8, %c0_9], %19 {strides = array<i32>} : memref<8x128xf32, #tpu.memory_space<vmem>>, vector<8x128xf32>,
    return
  }
  func.func @transform_0(%arg0: i32, %arg1: i32) -> (i32, i32) {
    %c0_i32 = arith.constant 0 : i32
    %c0_i32_0 = arith.constant 0 : i32
    return %arg1, %c0_i32 : i32, i32
  }
  func.func @transform_1(%arg0: i32, %arg1: i32) -> (i32, i32) {
    %c0_i32 = arith.constant 0 : i32
    %c0_i32_0 = arith.constant 0 : i32
    return %c0_i32, %arg0 : i32, i32
  }
  func.func @transform_2(%arg0: i32, %arg1: i32) -> (i32, i32) {
    %c0_i32 = arith.constant 0 : i32
    %c0_i32_0 = arith.constant 0 : i32
    return %c0_i32, %arg0 : i32, i32
  }
  func.func @transform_3(%arg0: i32, %arg1: i32) -> (i32, i32) {
    %c0_i32 = arith.constant 0 : i32
    return %arg1, %arg0 : i32, i32
  }
}

</mosaic_0001>

<bundles_post_ra>
// kernel: tpu_custom_call.1
= control target key start
LH: loop header
LB: loop body
LE: loop exit
PB: predicated region body
PF: predicated region fallthrough
CT: control target
= control target key end

     0   :  { %8 = vsyncpa [#allocation3], 0  ;;  %s959_s0 = inlined_call_operand.hbm [shape: f32[8,32], index: 0, kind: input, shape index: {}]   ;;  %s960_s1 = inlined_call_operand.hbm [shape: f32[32,128], index: 1, kind: input, shape index: {}]   ;;  %s961_s2 = inlined_call_operand.hbm [shape: f32[32,128], index: 2, kind: input, shape index: {}]   ;;  %s962_s3 = inlined_call_operand.hbm [shape: f32[8,128], index: 3, kind: output, shape index: {}]  }
   0x1   :  { %9 = vsyncpa [#allocation6], 0 }
   0x2   :  { %10 = vsyncpa [#allocation4], 0  ;;  %s707_s12 = smov [#allocation5]  }
   0x3   :  { %s26_s13 = sshll.u32 %s707_s12, 4  ;;  %s27_s13 = int_to_ptr.vmem [resolvable:$true] %s26_s13 }
   0x4   :  { %s629_s14 = scalar_lea.vmem %s27_s13, 512  ;;  %p634_p1 = scmp.lt.s32.totalorder %s27_s13, %s27_s13 }
   0x5   :  { %p630_p0 = scmp.ne.s32.totalorder %s27_s13, %s629_s14  ;;  %p635_p2 = scmp.lt.s32.totalorder %s629_s14, %s629_s14 }
   0x7   :  { %p636_p3 = por %p635_p2, %p634_p1 }
   0x9   :  { %p637_p4 = pnand %p636_p3, %p630_p0 }
   0xb   :  { %640 = shalt.err (!%p637_p4)
}
   0xc   :  { %s708_s15 = smov 128   ;;  %s709_s16 = smov 8  }
   0xd   :  { %32 = dma.hbm_to_vmem [thread:$0]  %s960_s1, 512, %s27_s13, [#allocation6], %s708_s15, %s708_s15, %s709_s16  }
   0xe   :  { %s710_s19 = smov [#allocation2]   ;;  %s711_s21 = smov [#allocation7]  }
   0xf   :  { %s17_s20 = sshll.u32 %s710_s19, 4  ;;  %s38_s22 = sshll.u32 %s711_s21, 4  ;;  %s18_s20 = int_to_ptr.vmem [resolvable:$true] %s17_s20  ;;  %s39_s22 = int_to_ptr.vmem [resolvable:$true] %s38_s22 }
  0x10   :  { %s649_s23 = scalar_lea.vmem %s18_s20, 128  ;;  %p654_p6 = scmp.lt.s32.totalorder %s18_s20, %s18_s20 }
  0x11   :  { %p650_p5 = scmp.ne.s32.totalorder %s18_s20, %s649_s23  ;;  %p655_p7 = scmp.lt.s32.totalorder %s649_s23, %s649_s23 }
  0x13   :  { %p656_p8 = por %p655_p7, %p654_p6 }
  0x15   :  { %p657_p9 = pnand %p656_p8, %p650_p5 }
  0x17   :  { %660 = shalt.err (!%p657_p9)
}
  0x18   :  { %20 = dma.hbm_to_vmem [thread:$0]  %s959_s0, 128, %s18_s20, [#allocation3]  }
  0x19   :  { %s669_s26 = scalar_lea.vmem %s39_s22, 512  ;;  %p674_p11 = scmp.lt.s32.totalorder %s39_s22, %s39_s22 }
  0x1a   :  { %p670_p10 = scmp.ne.s32.totalorder %s39_s22, %s669_s26  ;;  %p675_p12 = scmp.lt.s32.totalorder %s669_s26, %s669_s26 }
  0x1c   :  { %p676_p13 = por %p675_p12, %p674_p11 }
  0x1e   :  { %p677_p0 = pnand %p676_p13, %p670_p10 }
  0x20   :  { %680 = shalt.err (!%p677_p0)
}
  0x21   :  { %44 = dma.hbm_to_vmem [thread:$0]  %s961_s2, 512, %s39_s22, [#allocation6], %s708_s15, %s708_s15, %s709_s16  }
  0x22   :  { %701 = dma.done.wait [#allocation3], 128  }
  0x23   :  { %702 = vsyncadd [#allocation3], 4294967168 }
  0x24   :  { %703 = dma.done.wait [#allocation6], 1024  }
  0x25   :  { %704 = vsyncadd [#allocation6], 4294966272  ;;  %v63_v0 = vlaneseq  ;;  %v54_v4 = vld [vmem:[#allocation2] sm:$0xff]  ;;  %v742_v23 = vld [vmem:[#allocation5] sm:$0xff]  ;;  %vm519_vm0 = vcmask 1041409   ;;  %vm521_vm1 = vcmask 1042434  }
  0x26   :  { %v745_v27 = vld [vmem:[#allocation7] sm:$0xff]  ;;  %v748_v29 = vld [vmem:[#allocation5 + $0x8] sm:$0xff]  ;;  %v770_v47 = vld [vmem:[#allocation5 + $0x10] sm:$0xff]  ;;  %vm523_vm2 = vcmask 1043459   ;;  %vm525_vm3 = vcmask 1044484   ;;  %vm527_vm4 = vcmask 1045509  }
  0x27   :  { %v64_v1 = vshrl.u32 %v63_v0, 7  ;;  %v757_v35 = vld [vmem:[#allocation7 + $0x8] sm:$0xff]  ;;  %v781_v55 = vld [vmem:[#allocation7 + $0x10] sm:$0xff]  ;;  %vm529_vm5 = vcmask 1046534   ;;  %s712_s0 = smov [#allocation8]   ;;  %vm531_vm6 = vcmask 1047559  }
  0x28   :  { %s541_s2 = sshll.u32 %s712_s0, 4  ;;  %s542_s2 = int_to_ptr.vmem [resolvable:$true] %s541_s2 }
  0x29   :  { %v84_v2 = vsub.s32 1, %v64_v1  ;;  %v65_v3 = vsub.s32 0, %v64_v1  ;;  %v103_v7 = vsub.s32 2, %v64_v1  ;;  %v122_v9 = vsub.s32 3, %v64_v1  ;;  %s681_s28 = scalar_lea.vmem %s542_s2, 128  ;;  %p686_p2 = scmp.lt.s32.totalorder %s542_s2, %s542_s2 }
  0x2a   :  { %v141_v11 = vsub.s32 4, %v64_v1  ;;  %v160_v13 = vsub.s32 5, %v64_v1  ;;  %v179_v15 = vsub.s32 6, %v64_v1  ;;  %v198_v17 = vsub.s32 7, %v64_v1  ;;  %v794_v1 = vld [vmem:[#allocation5 + $0x18] sm:$0xff]  ;;  %p682_p1 = scmp.ne.s32.totalorder %s542_s2, %s681_s28  ;;  %p687_p3 = scmp.lt.s32.totalorder %s681_s28, %s681_s28 }
  0x2b   :  { %v85_v5 = vrot.slane %v54_v4, %v84_v2  ;;  %v66_v6 = vrot.slane %v54_v4, %v65_v3  ;;  %v104_v8 = vrot.slane %v54_v4, %v103_v7  ;;  %v123_v10 = vrot.slane %v54_v4, %v122_v9 }
  0x2c   :  { %v142_v12 = vrot.slane %v54_v4, %v141_v11  ;;  %v161_v14 = vrot.slane %v54_v4, %v160_v13  ;;  %v180_v16 = vrot.slane %v54_v4, %v179_v15  ;;  %v199_v18 = vrot.slane %v54_v4, %v198_v17  ;;  %p688_p4 = por %p687_p3, %p686_p2 }
  0x2d   :  { %87 = vbcast.lane.b32.xlu1 %v85_v5, 256  ;;  %68 = vbcast.lane.b32.xlu0 %v66_v6, 256 }
  0x2e   :  { %p689_p5 = pnand %p688_p4, %p682_p1 }
  0x31   :  { %91 = vbcast.lane.b32.xlu1 %v85_v5, 264  ;;  %72 = vbcast.lane.b32.xlu0 %v66_v6, 264 }
  0x35   :  { %110 = vbcast.lane.b32.xlu1 %v104_v8, 264  ;;  %106 = vbcast.lane.b32.xlu0 %v104_v8, 256 }
  0x39   :  { %95 = vbcast.lane.b32.xlu1 %v85_v5, 272  ;;  %76 = vbcast.lane.b32.xlu0 %v66_v6, 272 }
  0x3d   :  { %129 = vbcast.lane.b32.xlu1 %v123_v10, 264  ;;  %125 = vbcast.lane.b32.xlu0 %v123_v10, 256 }
  0x41   :  { %144 = vbcast.lane.b32.xlu1 %v142_v12, 256  ;;  %114 = vbcast.lane.b32.xlu0 %v104_v8, 272 }
  0x45   :  { %80 = vbcast.lane.b32.xlu1 %v66_v6, 280  ;;  %148 = vbcast.lane.b32.xlu0 %v142_v12, 264 }
  0x49   :  { %133 = vbcast.lane.b32.xlu1 %v123_v10, 272  ;;  %99 = vbcast.lane.b32.xlu0 %v85_v5, 280 }
  0x4d   :  { %167 = vbcast.lane.b32.xlu1 %v161_v14, 264  ;;  %163 = vbcast.lane.b32.xlu0 %v161_v14, 256 }
  0x51   :  { %152 = vbcast.lane.b32.xlu1 %v142_v12, 272  ;;  %118 = vbcast.lane.b32.xlu0 %v104_v8, 280 }
  0x55   :  { %186 = vbcast.lane.b32.xlu1 %v180_v16, 264  ;;  %182 = vbcast.lane.b32.xlu0 %v180_v16, 256 }
  0x59   :  { %171 = vbcast.lane.b32.xlu1 %v161_v14, 272  ;;  %137 = vbcast.lane.b32.xlu0 %v123_v10, 280 }
  0x5d   :  { %205 = vbcast.lane.b32.xlu1 %v199_v18, 264  ;;  %201 = vbcast.lane.b32.xlu0 %v199_v18, 256 }
  0x61   :  { %190 = vbcast.lane.b32.xlu1 %v180_v16, 272  ;;  %156 = vbcast.lane.b32.xlu0 %v142_v12, 280  ;;  %v807_v12 = vld [vmem:[#allocation7 + $0x18] sm:$0xff] }
  0x65   :  { %209 = vbcast.lane.b32.xlu1 %v199_v18, 272  ;;  %175 = vbcast.lane.b32.xlu0 %v161_v14, 280 }
  0x69   :  { %213 = vbcast.lane.b32.xlu1 %v199_v18, 280  ;;  %194 = vbcast.lane.b32.xlu0 %v180_v16, 280 }
  0x9f   :  { %v88_v19 = vpop.permute.xlu1 %87  ;;  %v69_v20 = vpop.permute.xlu0 %68 }
  0xa0   :  { %v219_v26 = vmul.f32 %v88_v19, %v742_v23  ;;  %v215_v28 = vmul.f32 %v69_v20, %v742_v23 }
  0xa2   :  { %v751_v32 = vadd.f32 %v219_v26, %v745_v27  ;;  %v755_v34 = vadd.f32 %v215_v28, %v745_v27 }
  0xa3   :  { %v92_v21 = vpop.permute.xlu1 %91  ;;  %v73_v22 = vpop.permute.xlu0 %72 }
  0xa4   :  { %v220_v33 = vmul.f32 %v92_v21, %v748_v29  ;;  %v283_v38 = vmul.f32 0.5, %v751_v32  ;;  %v216_v39 = vmul.f32 %v73_v22, %v748_v29  ;;  %v279_v42 = vmul.f32 0.5, %v755_v34 }
  0xa6   :  { %v762_v40 = vadd.f32 %v220_v33, %v757_v35  ;;  %557 = vtanh.f32 %v283_v38  ;;  %v768_v46 = vadd.f32 %v216_v39, %v757_v35 }
  0xa7   :  { %v111_v24 = vpop.permute.xlu1 %110  ;;  %v107_v25 = vpop.permute.xlu0 %106  ;;  %559 = vtanh.f32 %v279_v42 }
  0xa8   :  { %v224_v41 = vmul.f32 %v111_v24, %v748_v29  ;;  %v223_v43 = vmul.f32 %v107_v25, %v742_v23  ;;  %v284_v48 = vmul.f32 0.5, %v762_v40  ;;  %v280_v54 = vmul.f32 0.5, %v768_v46 }
  0xaa   :  { %v774_v49 = vadd.f32 %v224_v41, %v757_v35  ;;  %v777_v50 = vadd.f32 %v223_v43, %v745_v27  ;;  %561 = vtanh.f32 %v284_v48 }
  0xab   :  { %v96_v30 = vpop.permute.xlu1 %95  ;;  %v77_v31 = vpop.permute.xlu0 %76  ;;  %563 = vtanh.f32 %v280_v54 }
  0xac   :  { %v221_v53 = vmul.f32 %v96_v30, %v770_v47  ;;  %v217_v56 = vmul.f32 %v77_v31, %v770_v47  ;;  %v288_v57 = vmul.f32 0.5, %v774_v49  ;;  %v287_v58 = vmul.f32 0.5, %v777_v50 }
  0xae   :  { %v787_v61 = vadd.f32 %v221_v53, %v781_v55  ;;  %v790_v62 = vadd.f32 %v217_v56, %v781_v55  ;;  %565 = vtanh.f32 %v288_v57 }
  0xaf   :  { %v130_v36 = vpop.permute.xlu1 %129  ;;  %v126_v37 = vpop.permute.xlu0 %125  ;;  %567 = vtanh.f32 %v287_v58 }
  0xb0   :  { %v228_v63 = vmul.f32 %v130_v36, %v748_v29  ;;  %v227_v0 = vmul.f32 %v126_v37, %v742_v23  ;;  %v285_v5 = vmul.f32 0.5, %v787_v61  ;;  %v281_v8 = vmul.f32 0.5, %v790_v62 }
  0xb2   :  { %v801_v9 = vadd.f32 %v228_v63, %v757_v35  ;;  %v805_v11 = vadd.f32 %v227_v0, %v745_v27  ;;  %569 = vtanh.f32 %v285_v5 }
  0xb3   :  { %v145_v44 = vpop.permute.xlu1 %144  ;;  %v115_v45 = vpop.permute.xlu0 %114  ;;  %571 = vtanh.f32 %v281_v8 }
  0xb4   :  { %v231_v2 = vmul.f32 %v145_v44, %v742_v23  ;;  %v225_v6 = vmul.f32 %v115_v45, %v770_v47  ;;  %v558_v7 = vpop.eup %557  ;;  %v292_v22 = vmul.f32 0.5, %v801_v9  ;;  %v291_v25 = vmul.f32 0.5, %v805_v11 }
  0xb5   :  { %v560_v18 = vpop.eup %559  ;;  %v347_v19 = vadd.f32 1.0, %v558_v7 }
  0xb6   :  { %v811_v14 = vadd.f32 %v231_v2, %v745_v27  ;;  %v815_v20 = vadd.f32 %v225_v6, %v781_v55  ;;  %v343_v31 = vadd.f32 1.0, %v560_v18  ;;  %573 = vtanh.f32 %v292_v22 }
  0xb7   :  { %v81_v51 = vpop.permute.xlu1 %80  ;;  %v149_v52 = vpop.permute.xlu0 %148  ;;  %v379_v39 = vmul.f32 0.5, %v347_v19  ;;  %575 = vtanh.f32 %v291_v25 }
  0xb8   :  { %v218_v10 = vmul.f32 %v81_v51, %v794_v1  ;;  %v232_v13 = vmul.f32 %v149_v52, %v748_v29  ;;  %v562_v30 = vpop.eup %561  ;;  %v295_v33 = vmul.f32 0.5, %v811_v14  ;;  %v289_v41 = vmul.f32 0.5, %v815_v20 }
  0xb9   :  { %v564_v45 = vpop.eup %563  ;;  %v348_v48 = vadd.f32 1.0, %v562_v30  ;;  %v375_v54 = vmul.f32 0.5, %v343_v31  ;;  %v844_v63 = vmul.f32 %v379_v39, %v751_v32 }
  0xba   :  { %v820_v24 = vadd.f32 %v218_v10, %v807_v12  ;;  %v824_v26 = vadd.f32 %v232_v13, %v757_v35  ;;  %577 = vtanh.f32 %v295_v33  ;;  %v344_v5 = vadd.f32 1.0, %v564_v45 }
  0xbb   :  { %v134_v59 = vpop.permute.xlu1 %133  ;;  %v100_v60 = vpop.permute.xlu0 %99  ;;  %579 = vtanh.f32 %v289_v41  ;;  %v380_v8 = vmul.f32 0.5, %v348_v48 }
  0xbc   :  { %v229_v15 = vmul.f32 %v134_v59, %v770_v47  ;;  %v222_v21 = vmul.f32 %v100_v60, %v794_v1  ;;  %v282_v44 = vmul.f32 0.5, %v820_v24  ;;  %v296_v51 = vmul.f32 0.5, %v824_v26  ;;  %v566_v53 = vpop.eup %565 }
  0xbd   :  { %v568_v60 = vpop.eup %567  ;;  %v376_v33 = vmul.f32 0.5, %v344_v5 }
  0xbe   :  { %v829_v36 = vadd.f32 %v229_v15, %v781_v55  ;;  %v833_v42 = vadd.f32 %v222_v21, %v807_v12  ;;  %581 = vtanh.f32 %v282_v44  ;;  %v351_v13 = vadd.f32 1.0, %v568_v60 }
  0xbf   :  { %v168_v3 = vpop.permute.xlu1 %167  ;;  %v164_v4 = vpop.permute.xlu0 %163  ;;  %583 = vtanh.f32 %v296_v51  ;;  %v412_v60 = vmul.f32 %v380_v8, %v762_v40 }
  0xc0   :  { %v293_v56 = vmul.f32 0.5, %v829_v36  ;;  %v236_v57 = vmul.f32 %v168_v3, %v748_v29  ;;  %v286_v0 = vmul.f32 0.5, %v833_v42  ;;  %v235_v6 = vmul.f32 %v164_v4, %v742_v23  ;;  %v570_v21 = vpop.eup %569 }
  0xc1   :  { %v352_v3 = vadd.f32 1.0, %v566_v53  ;;  %v572_v31 = vpop.eup %571 }
  0xc2   :  { %585 = vtanh.f32 %v293_v56  ;;  %v854_v32 = vadd.f32 %v236_v57, %v757_v35  ;;  %v863_v22 = vadd.f32 %v235_v6, %v745_v27  ;;  %v345_v53 = vadd.f32 1.0, %v572_v31 }
  0xc3   :  { %v153_v16 = vpop.permute.xlu1 %152  ;;  %v119_v17 = vpop.permute.xlu0 %118  ;;  %587 = vtanh.f32 %v286_v0  ;;  %v384_v39 = vmul.f32 0.5, %v352_v3  ;;  %v408_v0 = vmul.f32 %v376_v33, %v768_v46 }
  0xc4   :  { %v226_v28 = vmul.f32 %v119_v17, %v794_v1  ;;  %v233_v43 = vmul.f32 %v153_v16, %v770_v47  ;;  %v299_v56 = vmul.f32 0.5, %v863_v22 }
  0xc6   :  { %v839_v52 = vadd.f32 %v226_v28, %v807_v12  ;;  %v848_v2 = vadd.f32 %v233_v43, %v781_v55  ;;  %v383_v43 = vmul.f32 0.5, %v351_v13 }
  0xc7   :  { %v187_v37 = vpop.permute.xlu1 %186  ;;  %v183_v38 = vpop.permute.xlu0 %182 }
  0xc8   :  { %v290_v10 = vmul.f32 0.5, %v839_v52  ;;  %v297_v4 = vmul.f32 0.5, %v848_v2  ;;  %v240_v25 = vmul.f32 %v187_v37, %v748_v29  ;;  %v239_v44 = vmul.f32 %v183_v38, %v742_v23 }
  0xc9   :  { %v300_v37 = vmul.f32 0.5, %v854_v32  ;;  %v415_v3 = vmul.f32 %v383_v43, %v777_v50 }
  0xca   :  { %589 = vtanh.f32 %v290_v10  ;;  %v881_v57 = vadd.f32 %v240_v25, %v757_v35 }
  0xcb   :  { %v172_v58 = vpop.permute.xlu1 %171  ;;  %v138_v59 = vpop.permute.xlu0 %137 }
  0xcc   :  { %v230_v7 = vmul.f32 %v138_v59, %v794_v1  ;;  %v237_v18 = vmul.f32 %v172_v58, %v770_v47  ;;  %v574_v58 = vpop.eup %573  ;;  %v407_v59 = vmul.f32 %v375_v54, %v755_v34  ;;  %v377_v54 = vmul.f32 0.5, %v345_v53 }
  0xcd   :  { %v576_v6 = vpop.eup %575  ;;  %v356_v8 = vadd.f32 1.0, %v574_v58 }
  0xce   :  { %v857_v15 = vadd.f32 %v230_v7, %v807_v12  ;;  %v877_v51 = vadd.f32 %v237_v18, %v781_v55  ;;  %v416_v7 = vmul.f32 %v384_v39, %v774_v49  ;;  %v304_v49 = vmul.f32 0.5, %v881_v57 }
  0xcf   :  { %v206_v16 = vpop.permute.xlu1 %205  ;;  %v202_v17 = vpop.permute.xlu0 %201  ;;  %v355_v25 = vadd.f32 1.0, %v576_v6  ;;  %v439_v31 = vadd.f32 %v408_v0, %v407_v59  ;;  %v409_v53 = vmul.f32 %v377_v54, %v790_v62 }
  0xd0   :  { %v244_v19 = vmul.f32 %v206_v16, %v748_v29  ;;  %v294_v28 = vmul.f32 0.5, %v857_v15  ;;  %v243_v30 = vmul.f32 %v202_v17, %v742_v23  ;;  %v349_v29 = vadd.f32 1.0, %v570_v21  ;;  %v578_v16 = vpop.eup %577 }
  0xd1   :  { %v301_v34 = vmul.f32 0.5, %v877_v51  ;;  %v580_v46 = vpop.eup %579  ;;  %v448_v21 = vadd.f32 %v412_v60, %v844_v63  ;;  %v359_v0 = vadd.f32 1.0, %v578_v16 }
  0xd2   :  { %v869_v41 = vadd.f32 %v244_v19, %v757_v35  ;;  %591 = vtanh.f32 %v294_v28  ;;  %v873_v45 = vadd.f32 %v243_v30, %v745_v27  ;;  %v891_v35 = vadd.f32 %v239_v44, %v745_v27  ;;  %v582_v27 = vpop.eup %581 }
  0xd3   :  { %v191_v48 = vpop.permute.xlu1 %190  ;;  %593 = vtanh.f32 %v297_v4  ;;  %v157_v38 = vpop.permute.xlu0 %156  ;;  %v381_v17 = vmul.f32 0.5, %v349_v29  ;;  %v353_v33 = vadd.f32 1.0, %v580_v46  ;;  %v346_v58 = vadd.f32 1.0, %v582_v27 }
  0xd4   :  { %v241_v23 = vmul.f32 %v191_v48, %v770_v47  ;;  %v308_v5 = vmul.f32 0.5, %v869_v41  ;;  %v307_v10 = vmul.f32 0.5, %v873_v45  ;;  %595 = vtanh.f32 %v300_v37  ;;  %v584_v19 = vpop.eup %583 }
  0xd5   :  { %v234_v40 = vmul.f32 %v157_v38, %v794_v1  ;;  %597 = vtanh.f32 %v299_v56  ;;  %v303_v28 = vmul.f32 0.5, %v891_v35  ;;  %v586_v30 = vpop.eup %585  ;;  %v907_v48 = vadd.f32 %v416_v7, %v415_v3 }
  0xd6   :  { %v898_v50 = vadd.f32 %v241_v23, %v781_v55  ;;  %599 = vtanh.f32 %v308_v5  ;;  %v588_v44 = vpop.eup %587  ;;  %v413_v37 = vmul.f32 %v381_v17, %v787_v61  ;;  %v388_v56 = vmul.f32 0.5, %v356_v8 }
  0xd7   :  { %v210_v13 = vpop.permute.xlu1 %209  ;;  %v901_v4 = vadd.f32 %v234_v40, %v807_v12  ;;  %601 = vtanh.f32 %v307_v10  ;;  %v176_v43 = vpop.permute.xlu0 %175  ;;  %v387_v38 = vmul.f32 0.5, %v355_v25  ;;  %v385_v5 = vmul.f32 0.5, %v353_v33 }
  0xd8   :  { %v245_v18 = vmul.f32 %v210_v13, %v770_v47  ;;  %603 = vtanh.f32 %v301_v34  ;;  %v305_v47 = vmul.f32 0.5, %v898_v50  ;;  %v590_v23 = vpop.eup %589  ;;  %v238_v6 = vmul.f32 %v176_v43, %v794_v1 }
  0xd9   :  { %v298_v39 = vmul.f32 0.5, %v901_v4  ;;  %605 = vtanh.f32 %v304_v49  ;;  %v360_v3 = vadd.f32 1.0, %v584_v19  ;;  %v357_v61 = vadd.f32 1.0, %v586_v30 }
  0xda   :  { %v911_v29 = vadd.f32 %v245_v18, %v781_v55  ;;  %v350_v10 = vadd.f32 1.0, %v588_v44  ;;  %v354_v62 = vadd.f32 1.0, %v590_v23  ;;  %v919_v13 = vadd.f32 %v238_v6, %v807_v12 }
  0xdb   :  { %v214_v63 = vpop.permute.xlu1 %213  ;;  %607 = vtanh.f32 %v298_v39  ;;  %v195_v34 = vpop.permute.xlu0 %194  ;;  %v420_v16 = vmul.f32 %v388_v56, %v801_v9  ;;  %v419_v40 = vmul.f32 %v387_v38, %v805_v11  ;;  %v378_v46 = vmul.f32 0.5, %v346_v58 }
  0xdc   :  { %609 = vtanh.f32 %v303_v28  ;;  %v309_v59 = vmul.f32 0.5, %v911_v29  ;;  %v246_v55 = vmul.f32 %v214_v63, %v794_v1  ;;  %v391_v49 = vmul.f32 0.5, %v359_v0 }
  0xdd   :  { %611 = vtanh.f32 %v305_v47  ;;  %v302_v8 = vmul.f32 0.5, %v919_v13  ;;  %v449_v25 = vadd.f32 %v448_v21, %v413_v37  ;;  %v389_v28 = vmul.f32 0.5, %v357_v61 }
  0xde   :  { %613 = vtanh.f32 %v309_v59  ;;  %v922_v17 = vadd.f32 %v246_v55, %v807_v12  ;;  %v382_v30 = vmul.f32 0.5, %v350_v10  ;;  %v242_v33 = vmul.f32 %v195_v34, %v794_v1 }
  0xdf   :  { %v592_v60 = vpop.eup %591  ;;  %v417_v43 = vmul.f32 %v385_v5, %v815_v20  ;;  %v392_v9 = vmul.f32 0.5, %v360_v3  ;;  %v386_v44 = vmul.f32 0.5, %v354_v62  ;;  %615 = vtanh.f32 %v302_v8 }
  0xe0   :  { %v594_v7 = vpop.eup %593  ;;  %v358_v54 = vadd.f32 1.0, %v592_v60  ;;  %v310_v18 = vmul.f32 0.5, %v922_v17  ;;  %v440_v47 = vadd.f32 %v439_v31, %v409_v53  ;;  %v410_v63 = vmul.f32 %v378_v46, %v820_v24 }
  0xe1   :  { %v361_v27 = vadd.f32 1.0, %v594_v7  ;;  %v596_v19 = vpop.eup %595  ;;  %v466_v38 = vadd.f32 %v420_v16, %v419_v40  ;;  %v423_v21 = vmul.f32 %v391_v49, %v811_v14  ;;  %v933_v58 = vadd.f32 %v242_v33, %v807_v12 }
  0xe2   :  { %v598_v39 = vpop.eup %597  ;;  %v390_v56 = vmul.f32 0.5, %v358_v54  ;;  %617 = vtanh.f32 %v310_v18  ;;  %v421_v20 = vmul.f32 %v389_v28, %v829_v36  ;;  %v414_v59 = vmul.f32 %v382_v30, %v833_v42 }
  0xe3   :  { %v600_v11 = vpop.eup %599  ;;  %v393_v37 = vmul.f32 0.5, %v361_v27  ;;  %v364_v60 = vadd.f32 1.0, %v596_v19  ;;  %v363_v0 = vadd.f32 1.0, %v598_v39  ;;  %v458_v24 = vadd.f32 %v907_v48, %v417_v43 }
  0xe4   :  { %v602_v23 = vpop.eup %601  ;;  %v424_v53 = vmul.f32 %v392_v9, %v824_v26  ;;  %v418_v5 = vmul.f32 %v386_v44, %v839_v52  ;;  %v306_v14 = vmul.f32 0.5, %v933_v58  ;;  %v441_v55 = vadd.f32 %v440_v47, %v410_v63 }
  0xe5   :  { %v604_v1 = vpop.eup %603  ;;  %v422_v12 = vmul.f32 %v390_v56, %v857_v15  ;;  %v372_v7 = vadd.f32 1.0, %v600_v11  ;;  %v371_v3 = vadd.f32 1.0, %v602_v23  ;;  %v425_v42 = vmul.f32 %v393_v37, %v848_v2 }
  0xe6   :  { %v606_v31 = vpop.eup %605  ;;  %v365_v61 = vadd.f32 1.0, %v604_v1  ;;  %619 = vtanh.f32 %v306_v14  ;;  %v467_v62 = vadd.f32 %v466_v38, %v421_v20  ;;  %v450_v48 = vadd.f32 %v449_v25, %v414_v59 }
  0xe7   :  { %v396_v34 = vmul.f32 0.5, %v364_v60  ;;  %v395_v26 = vmul.f32 0.5, %v363_v0  ;;  %v475_v52 = vadd.f32 %v424_v53, %v423_v21  ;;  %v459_v40 = vadd.f32 %v458_v24, %v418_v5 }
  0xe8   :  { %v608_v6 = vpop.eup %607  ;;  %v368_v46 = vadd.f32 1.0, %v606_v31  ;;  %v468_v15 = vadd.f32 %v467_v62, %v422_v12  ;;  %v404_v8 = vmul.f32 0.5, %v372_v7  ;;  %v403_v18 = vmul.f32 0.5, %v371_v3 }
  0xe9   :  { %v610_v36 = vpop.eup %609  ;;  %v362_v10 = vadd.f32 1.0, %v608_v6  ;;  %v476_v19 = vadd.f32 %v475_v52, %v425_v42  ;;  %v397_v28 = vmul.f32 0.5, %v365_v61  ;;  %v442_v33 = vrot.slane %v441_v55, 4 }
  0xea   :  { %v612_v16 = vpop.eup %611  ;;  %v367_v27 = vadd.f32 1.0, %v610_v36  ;;  %v451_v39 = vrot.slane %v450_v48, 4  ;;  %v428_v25 = vmul.f32 %v396_v34, %v854_v32  ;;  %v427_v43 = vmul.f32 %v395_v26, %v863_v22 }
  0xeb   :  { %v394_v54 = vmul.f32 0.5, %v362_v10  ;;  %v614_v49 = vpop.eup %613  ;;  %v460_v9 = vrot.slane %v459_v40, 4  ;;  %v369_v44 = vadd.f32 1.0, %v612_v16  ;;  %v400_v56 = vmul.f32 0.5, %v368_v46 }
  0xec   :  { %v373_v30 = vadd.f32 1.0, %v614_v49  ;;  %v616_v63 = vpop.eup %615  ;;  %v469_v23 = vrot.slane %v468_v15, 4  ;;  %v436_v38 = vmul.f32 %v404_v8, %v869_v41  ;;  %v435_v21 = vmul.f32 %v403_v18, %v873_v45 }
  0xed   :  { %v426_v2 = vmul.f32 %v394_v54, %v901_v4  ;;  %v399_v4 = vmul.f32 0.5, %v367_v27  ;;  %v429_v1 = vmul.f32 %v397_v28, %v877_v51  ;;  %v366_v59 = vadd.f32 1.0, %v616_v63 }
  0xee   :  { %v405_v47 = vmul.f32 0.5, %v373_v30  ;;  %v443_v32 = vadd.f32 %v442_v33, %v441_v55  ;;  %v452_v60 = vadd.f32 %v451_v39, %v450_v48  ;;  %v484_v31 = vadd.f32 %v428_v25, %v427_v43 }
  0xef   :  { %v477_v11 = vadd.f32 %v476_v19, %v426_v2  ;;  %v618_v37 = vpop.eup %617  ;;  %v461_v24 = vadd.f32 %v460_v9, %v459_v40  ;;  %v401_v53 = vmul.f32 0.5, %v369_v44  ;;  %v398_v5 = vmul.f32 0.5, %v366_v59 }
  0xf0   :  { %v437_v22 = vmul.f32 %v405_v47, %v911_v29  ;;  %v374_v0 = vadd.f32 1.0, %v618_v37  ;;  %v432_v14 = vmul.f32 %v400_v56, %v881_v57  ;;  %v470_v41 = vadd.f32 %v469_v23, %v468_v15 }
  0xf1   :  { %v478_v20 = vrot.slane %v477_v11, 4  ;;  %v502_v6 = vadd.f32 %v436_v38, %v435_v21  ;;  %v431_v12 = vmul.f32 %v399_v4, %v891_v35  ;;  %v485_v7 = vadd.f32 %v484_v31, %v429_v1 }
  0xf2   :  { %v406_v45 = vmul.f32 0.5, %v374_v0  ;;  %v430_v3 = vmul.f32 %v398_v5, %v919_v13  ;;  %v453_v36 = vrot.slane %v452_v60, 2  ;;  %v462_v61 = vrot.slane %v461_v24, 2 }
  0xf3   :  { %v479_v51 = vadd.f32 %v478_v20, %v477_v11  ;;  %v620_v55 = vpop.eup %619  ;;  %v503_v42 = vadd.f32 %v502_v6, %v437_v22  ;;  %v433_v10 = vmul.f32 %v401_v53, %v898_v50  ;;  %v444_v57 = vrot.slane %v443_v32, 2 }
  0xf4   :  { %v438_v29 = vmul.f32 %v406_v45, %v922_v17  ;;  %v486_v62 = vadd.f32 %v485_v7, %v430_v3  ;;  %v370_v48 = vadd.f32 1.0, %v620_v55  ;;  %v471_v34 = vrot.slane %v470_v41, 2 }
  0xf5   :  { %v493_v16 = vadd.f32 %v432_v14, %v431_v12  ;;  %v480_v52 = vrot.slane %v479_v51, 2  ;;  %v454_v46 = vadd.f32 %v453_v36, %v452_v60  ;;  %v463_v13 = vadd.f32 %v462_v61, %v461_v24 }
  0xf6   :  { %v504_v26 = vadd.f32 %v503_v42, %v438_v29  ;;  %v487_v35 = vrot.slane %v486_v62, 4  ;;  %v402_v40 = vmul.f32 0.5, %v370_v48  ;;  %v445_v17 = vadd.f32 %v444_v57, %v443_v32 }
  0xf7   :  { %v494_v49 = vadd.f32 %v493_v16, %v433_v10  ;;  %v472_v8 = vadd.f32 %v471_v34, %v470_v41  ;;  %v481_v50 = vadd.f32 %v480_v52, %v479_v51  ;;  %v455_v2 = vrot.slane %v454_v46, 1 }
  0xf8   :  { %v505_v54 = vrot.slane %v504_v26, 4  ;;  %v488_v27 = vadd.f32 %v487_v35, %v486_v62  ;;  %v434_v15 = vmul.f32 %v402_v40, %v933_v58  ;;  %v464_v33 = vrot.slane %v463_v13, 1 }
  0xf9   :  { %v446_v43 = vrot.slane %v445_v17, 1  ;;  %v473_v9 = vrot.slane %v472_v8, 1  ;;  %v482_v11 = vrot.slane %v481_v50, 1  ;;  %v456_v63 = vadd.f32 %v455_v2, %v454_v46 }
  0xfa   :  { %v506_v18 = vadd.f32 %v505_v54, %v504_v26  ;;  %v489_v19 = vrot.slane %v488_v27, 2  ;;  %v495_v28 = vadd.f32 %v494_v49, %v434_v15  ;;  %v465_v23 = vadd.f32 %v464_v33, %v463_v13 }
  0xfb   :  { %v447_v38 = vadd.f32 %v446_v43, %v445_v17  ;;  %v474_v21 = vadd.f32 %v473_v9, %v472_v8  ;;  %v483_v4 = vadd.f32 %v482_v11, %v481_v50 }
  0xfc   :  { %v507_v30 = vrot.slane %v506_v18, 2  ;;  %v490_v39 = vadd.f32 %v489_v19, %v488_v27  ;;  %v496_v25 = vrot.slane %v495_v28, 4 }
  0xfd   :  { %v520_v59 = vsel %vm519_vm0, %v456_v63, %v447_v38 }
  0xfe   :  { %v508_v44 = vadd.f32 %v507_v30, %v506_v18  ;;  %v497_v47 = vadd.f32 %v496_v25, %v495_v28  ;;  %v491_v56 = vrot.slane %v490_v39, 1  ;;  %v522_v60 = vsel %vm521_vm1, %v465_v23, %v520_v59 }
  0xff   :  { %v524_v0 = vsel %vm523_vm2, %v474_v21, %v522_v60 }
 0x100   :  { %v498_v58 = vrot.slane %v497_v47, 2  ;;  %v509_v37 = vrot.slane %v508_v44, 1  ;;  %v492_v20 = vadd.f32 %v491_v56, %v490_v39  ;;  %v526_v24 = vsel %vm525_vm3, %v483_v4, %v524_v0 }
 0x102   :  { %v499_v1 = vadd.f32 %v498_v58, %v497_v47  ;;  %v510_v22 = vadd.f32 %v509_v37, %v508_v44  ;;  %v528_v53 = vsel %vm527_vm4, %v492_v20, %v526_v24 }
 0x104   :  { %v500_v32 = vrot.slane %v499_v1, 1 }
 0x106   :  { %v501_v31 = vadd.f32 %v500_v32, %v499_v1 }
 0x108   :  { %v530_v5 = vsel %vm529_vm5, %v501_v31, %v528_v53 }
 0x109   :  { %v532_v14 = vsel %vm531_vm6, %v510_v22, %v530_v5 }
 0x10a   :  { %534 = vst [vmem:[#allocation8] sm:$0xff] %v532_v14 }
 0x10b   :  { %692 = shalt.err (!%p689_p5)
}
 0x10c   :  { %544 = dma.vmem_to_hbm [thread:$0]  %s542_s2, 128, %s962_s3, [#allocation4]  }
 0x10d   :  { %705 = dma.done.wait [#allocation4], 128  }
 0x10e   :  { %706 = vsyncadd [#allocation4], 4294967168 }
 0x10f   :  { %548 = vsyncpa [#allocation3], 1 }
 0x110   :  { %549 = vsyncpa [#allocation6], 1 }
 0x111   :  { %550 = vsyncpa [#allocation4], 1 }

</bundles_post_ra>
